<compile_context>
chip_gen: v7x
topology: tpu7x:2x2x1
jax: 0.10.0
libtpu: 0.0.40
codegen_flags: <defaults>
</compile_context>

<pallas_src>
import functools

import jax
import jax.numpy as jnp
from jax.experimental import pallas as pl
from jax.experimental.pallas import tpu as pltpu

_LANE = 128   # vreg lane width
_SUB = 8      # vreg sublane count


def _round_up(n, m):
    return ((n + m - 1) // m) * m


def _round_down(n, m):
    return (n // m) * m


def _vmem_capacity_bytes():
    """Physical VMEM per TensorCore (128 MiB on v5e/v6e, 64 MiB on v7x)."""
    try:
        cap = getattr(pltpu.get_tpu_info(), "vmem_capacity_bytes", None)
        if cap:
            return int(cap)
    except Exception:
        pass
    return 64 << 20   # conservative fallback, safe on every generation


def _choose_tiles(N, HW, itemsize, budget):
    """Tile the flattened (N, HW) problem.

    Returns (TR, grid_r, N_out, THW, grid_k).  One (TR, THW) input block is
    double-buffered within `budget`.  No input padding is ever needed:
      * ragged HW  -> lane mask inside the kernel on the last reduction step,
      * ragged rows -> TR divides N, or TR == N (full-extent block); only in
        the pathological case (N not a multiple of 8 AND too large for one
        block) do row blocks overrun N, and those rows land in output rows
        >= N which the wrapper slices off.
    """
    max_elems = max(budget // (2 * itemsize), _SUB * _LANE)

    # ---- reduction (lane) tile -------------------------------------------
    hw_pad = _round_up(HW, _LANE)                 # lane-padded VMEM footprint
    if hw_pad * _SUB <= max_elems:
        thw, grid_k = HW, 1                       # whole HW in one tile
    else:
        thw = _round_down(max_elems // _SUB, _LANE)
        thw = max(_LANE, min(thw, 4096, hw_pad))  # wide-but-bounded lanes
        grid_k = pl.cdiv(HW, thw)

    # ---- row (sublane) tile ------------------------------------------------
    thw_pad = _round_up(thw, _LANE)
    tr_cap = max(_SUB, _round_down(max_elems // thw_pad, _SUB))
    tr_cap = min(tr_cap, 8192)
    if N % _SUB == 0:
        tr = min(tr_cap, N)
        if N >= 2 * _SUB:                 # keep >= 2 row blocks (2 TensorCores)
            tr = min(tr, _round_down(N // 2, _SUB))
        while N % tr:                     # largest multiple-of-8 tile dividing N
            tr -= _SUB
        grid_r = N // tr
    elif N <= tr_cap:
        tr, grid_r = N, 1                 # full-extent row block
    else:
        # Pathological ragged-row fallback (never hit for ResNet-like C): the
        # last row block reads out-of-bounds rows whose garbage sums only
        # reach output rows >= N, which the wrapper discards.
        tr = max(_SUB, min(tr_cap, _round_down(N // 2, _SUB)))
        grid_r = pl.cdiv(N, tr)
    return tr, grid_r, grid_r * tr, thw, grid_k


def _gap_sum_kernel(x_ref, o_ref, *, inv_hw):
    """Single reduction step: the whole HW extent fits in one tile."""
    x = x_ref[...].astype(jnp.float32)
    o_ref[...] = (jnp.sum(x, axis=-1, keepdims=True) * inv_hw).astype(o_ref.dtype)


def _gap_acc_kernel(x_ref, o_ref, acc_ref, *, inv_hw, hw_rem):
    """Multi-step reduction; grid = (row_blocks, hw_tiles).

    acc_ref is a (TR, 128) f32 lane-slab accumulator: every step does only
    element-wise VPU adds over 128-lane slabs; the 128->1 cross-lane (XLU)
    reduce and the single 1/HW scale are deferred to the last step.  The last
    HW tile is ragged iff hw_rem > 0; its out-of-bounds lanes are zeroed.
    """
    k = pl.program_id(1)
    last = pl.num_programs(1) - 1

    @pl.when(k == 0)
    def _init():
        acc_ref[...] = jnp.zeros_like(acc_ref)

    def _accumulate(x):
        acc = acc_ref[...]
        for j in range(x.shape[-1] // _LANE):      # THW is a multiple of 128
            acc = acc + x[:, j * _LANE:(j + 1) * _LANE]
        acc_ref[...] = acc

    if hw_rem == 0:
        _accumulate(x_ref[...].astype(jnp.float32))
    else:
        @pl.when(k < last)
        def _full_tile():
            _accumulate(x_ref[...].astype(jnp.float32))

        @pl.when(k == last)
        def _ragged_tile():
            x = x_ref[...].astype(jnp.float32)
            col = jax.lax.broadcasted_iota(jnp.int32, x.shape, 1)
            _accumulate(jnp.where(col < hw_rem, x, 0.0))

    @pl.when(k == last)
    def _finalize():
        o_ref[...] = (jnp.sum(acc_ref[...], axis=-1, keepdims=True)
                      * inv_hw).astype(o_ref.dtype)


def global_average_pooling(x, *, vmem_budget_bytes=None):
    """x: (B, C, *spatial) -> (B, C); mean over all trailing spatial dims."""
    B, C = x.shape[0], x.shape[1]
    HW = 1
    for d in x.shape[2:]:
        HW *= int(d)
    N = B * C
    itemsize = jnp.dtype(x.dtype).itemsize

    x2 = x.reshape(N, HW)          # metadata-only view, no HBM copy

    capacity = _vmem_capacity_bytes()
    if vmem_budget_bytes is None:
        budget = (capacity * 3) // 8        # ~48 MiB (v5e/v6e), ~24 MiB (v7x)
    else:
        budget = min(int(vmem_budget_bytes), capacity // 2)
    budget = max(budget, 2 * _SUB * _LANE * itemsize)

    tr, grid_r, n_out, thw, grid_k = _choose_tiles(N, HW, itemsize, budget)
    inv_hw = 1.0 / HW

    # Explicit VMEM limit from the actual (lane-padded) tiles: double-buffered
    # input, f32 cast temp, output buffers, accumulator, plus headroom;
    # clamped below physical per-core capacity (v7x-safe).
    thw_pad = _round_up(thw, _LANE)
    in_buf = tr * thw_pad * itemsize
    cast_buf = tr * thw_pad * 4 if itemsize != 4 else 0
    out_buf = tr * _LANE * max(itemsize, 4)
    acc_buf = tr * _LANE * 4 if grid_k > 1 else 0
    vmem_limit = 2 * in_buf + cast_buf + 2 * out_buf + acc_buf + (4 << 20)
    vmem_limit = int(min(max(vmem_limit, 8 << 20), (capacity * 3) // 4))

    if grid_k == 1:
        kernel = functools.partial(_gap_sum_kernel, inv_hw=inv_hw)
        grid = (grid_r,)
        in_specs = [pl.BlockSpec((tr, thw), lambda r: (r, 0))]
        out_specs = pl.BlockSpec((tr, 1), lambda r: (r, 0))
        scratch_shapes = []
        dim_sem = ("parallel",)
    else:
        hw_rem = HW % thw
        kernel = functools.partial(_gap_acc_kernel, inv_hw=inv_hw, hw_rem=hw_rem)
        grid = (grid_r, grid_k)
        in_specs = [pl.BlockSpec((tr, thw), lambda r, k: (r, k))]
        out_specs = pl.BlockSpec((tr, 1), lambda r, k: (r, 0))
        scratch_shapes = [pltpu.VMEM((tr, _LANE), jnp.float32)]
        dim_sem = ("parallel", "arbitrary")
        # Note: with spare VMEM on v5e/v6e, pipeline_mode=pl.Buffered(3) on the
        # input spec can cover strided-DMA fill jitter for a few extra percent.

    out = pl.pallas_call(
        kernel,
        out_shape=jax.ShapeDtypeStruct((n_out, 1), x.dtype),
        grid_spec=pltpu.PrefetchScalarGridSpec(
            num_scalar_prefetch=0,
            grid=grid,
            in_specs=in_specs,
            out_specs=out_specs,
            scratch_shapes=scratch_shapes,
        ),
        compiler_params=pltpu.CompilerParams(
            dimension_semantics=dim_sem,
            vmem_limit_bytes=vmem_limit,
        ),
    )(x2)

    return out[:N, 0].reshape(B, C)


if __name__ == "__main__":
    key = jax.random.PRNGKey(0)

    # 1) Small shape implied by the module: single-tile fast path.
    B, C, H, W = 2, 4, 16, 16
    x = jax.random.normal(key, (B, C, H, W), dtype=jnp.float32)
    out = jax.block_until_ready(global_average_pooling(x))
    ref = jnp.mean(x.reshape(B, C, -1), axis=2)
    assert out.shape == (B, C)
    assert jnp.allclose(out, ref, atol=1e-5, rtol=1e-5)

    # 2) Tiny VMEM budget forces the multi-step reduction with a ragged
    #    (masked) last HW tile and multiple parallel row blocks.
    B2, C2, H2, W2 = 2, 8, 17, 17
    x2 = jax.random.normal(jax.random.PRNGKey(0), (B2, C2, H2, W2), dtype=jnp.float32)
    out2 = jax.block_until_ready(
        global_average_pooling(x2, vmem_budget_bytes=16 * 1024))
    ref2 = jnp.mean(x2.reshape(B2, C2, -1), axis=2)
    assert out2.shape == (B2, C2)
    assert jnp.allclose(out2, ref2, atol=1e-5, rtol=1e-5)

    # 3) Row count (B*C) not a multiple of 8 -> full-extent row block, no padding.
    B3, C3, H3, W3 = 3, 5, 4, 4
    x3 = jax.random.normal(jax.random.PRNGKey(1), (B3, C3, H3, W3), dtype=jnp.float32)
    out3 = jax.block_until_ready(global_average_pooling(x3))
    ref3 = jnp.mean(x3.reshape(B3, C3, -1), axis=2)
    assert out3.shape == (B3, C3)
    assert jnp.allclose(out3, ref3, atol=1e-5, rtol=1e-5)

    print("KERNEL_OK")
</pallas_src>

<mosaic_0001>
module attributes {stable_mosaic.version = 11 : i64} {
  func.func @_gap_sum_kernel(%arg0: i32, %arg1: memref<8x256xf32, #tpu.memory_space<vmem>>, %arg2: memref<8x1xf32, #tpu.memory_space<vmem>>) attributes {dimension_semantics = [#tpu.dimension_semantics<parallel>], iteration_bounds = array<i64: 1>, scalar_prefetch = 0 : i64, scratch_operands = 0 : i64, tpu.core_type = #tpu.core_type<tc>, window_params = [{transform_indices = @transform_0, window_bounds = array<i64: 8, 256>}, {transform_indices = @transform_1, window_bounds = array<i64: 8, 1>}]} {
    %c0 = arith.constant 0 : index
    %c0_0 = arith.constant 0 : index
    %0 = vector.load %arg1[%c0, %c0_0] : memref<8x256xf32, #tpu.memory_space<vmem>>, vector<8x256xf32>
    %cst = arith.constant dense<0.000000e+00> : vector<8xf32>
    %1 = vector.multi_reduction <add>, %0, %cst [1] : vector<8x256xf32> to vector<8xf32>
    %2 = vector.shape_cast %1 : vector<8xf32> to vector<8x1xf32>
    %cst_1 = arith.constant 3.906250e-03 : f32
    %3 = vector.broadcast %cst_1 : f32 to vector<8x1xf32>
    %4 = arith.mulf %2, %3 : vector<8x1xf32>
    %c0_2 = arith.constant 0 : index
    %c0_3 = arith.constant 0 : index
    %5 = vector.load %arg2[%c0_2, %c0_3] : memref<8x1xf32, #tpu.memory_space<vmem>>, vector<8x1xf32>
    tpu.vector_store %arg2[%c0_2, %c0_3], %4 {strides = array<i32>} : memref<8x1xf32, #tpu.memory_space<vmem>>, vector<8x1xf32>,
    return
  }
  func.func @transform_0(%arg0: i32) -> (i32, i32) {
    %c0_i32 = arith.constant 0 : i32
    %c0_i32_0 = arith.constant 0 : i32
    return %arg0, %c0_i32 : i32, i32
  }
  func.func @transform_1(%arg0: i32) -> (i32, i32) {
    %c0_i32 = arith.constant 0 : i32
    %c0_i32_0 = arith.constant 0 : i32
    return %arg0, %c0_i32 : i32, i32
  }
}

</mosaic_0001>

<bundles_post_ra>
// kernel: tpu_custom_call.1
= control target key start
LH: loop header
LB: loop body
LE: loop exit
PB: predicated region body
PF: predicated region fallthrough
CT: control target
= control target key end

     0   :  { %6 = vsyncpa [#allocation3], 0  ;;  %s58_s6 = smov [#allocation2]   ;;  %s84_s0 = inlined_call_operand.hbm [shape: f32[8,256], index: 0, kind: input, shape index: {}]   ;;  %s85_s1 = inlined_call_operand.vmem [shape: f32[8,1], index: 1, kind: output, shape index: {}]  }
   0x1   :  { %s13_s7 = sshll.u32 %s58_s6, 4  ;;  %s34_s10 = scalar_lea.hbm %s84_s0, 256  ;;  %s14_s7 = int_to_ptr.vmem [resolvable:$true] %s13_s7 }
   0x2   :  { %p35_p0 = scmp.ne.s32.totalorder %s84_s0, %s34_s10  ;;  %p38_p1 = scmp.lt.u32.totalorder %s34_s10, %s84_s0 }
   0x4   :  { %p40_p2 = pnand %p38_p1, %p35_p0 }
   0x6   :  { %43 = shalt.err (!%p40_p2)
}
   0x7   :  { %s44_s15 = scalar_lea.vmem %s14_s7, 256  ;;  %p49_p4 = scmp.lt.s32.totalorder %s14_s7, %s14_s7 }
   0x8   :  { %p45_p3 = scmp.ne.s32.totalorder %s14_s7, %s44_s15  ;;  %p50_p5 = scmp.lt.s32.totalorder %s44_s15, %s44_s15 }
   0xa   :  { %p51_p6 = por %p50_p5, %p49_p4 }
   0xc   :  { %p52_p7 = pnand %p51_p6, %p45_p3 }
   0xe   :  { %55 = shalt.err (!%p52_p7)
}
   0xf   :  { %16 = dma.hbm_to_vmem [thread:$0]  %s84_s0, 256, %s14_s7, [#allocation3]  }
  0x10   :  { %56 = dma.done.wait [#allocation3], 256  }
  0x11   :  { %57 = vsyncadd [#allocation3], 4294967040  ;;  %v20_v0 = vld [vmem:[#allocation2] sm:$0xff]  ;;  %v21_v1 = vld [vmem:[#allocation2 + $0x8] sm:$0xff]  ;;  %vm26_vm0 = vcmask 7168  }
  0x12   :  { %v22_v2 = vadd.f32 %v21_v1, %v20_v0 }
  0x14   :  { %23 = vadd.xlane.f32.xlu0 %v22_v2 }
  0xa1   :  { %v24_v3 = vpop.xlane.xlu0 %23 }
  0xa2   :  { %v25_v4 = vmul.f32 0.00390625, %v24_v3 }
  0xa4   :  { %27 = vst.msk [vmem:[%s85_s1] sm:$0xff] %vm26_vm0, %v25_v4 }
  0xa5   :  { %32 = vsyncpa [#allocation3], 1 }

</bundles_post_ra>
